<compile_context>
chip_gen: v7x
topology: tpu7x:2x2x1
jax: 0.10.0
libtpu: 0.0.40
codegen_flags: <defaults>
</compile_context>

<pallas_src>
import math

import jax
import jax.numpy as jnp
from jax.experimental import pallas as pl
from jax.experimental.pallas import tpu as pltpu

HIDDEN = 128            # config.hidden_size
VOCAB = 256             # config.vocab_size
LAYER_NORM_EPS = 1e-12
INITIALIZER_RANGE = 0.02
IGNORE_INDEX = -100     # CrossEntropyLoss default
_INV_SQRT2 = 1.0 / math.sqrt(2.0)
_VMEM_LIMIT = 32 * 1024 * 1024   # scoped VMEM: safe on v5e/v6e/v7x


# ---------------------------------------------------------------------------
# Shared per-tile computation:
#   h = LayerNorm(gelu(x @ W1 + b1)) ; logits = h @ W2 + b2   (f32 logits)
# ---------------------------------------------------------------------------
def _tile_scores(x_ref, w1_ref, b1_ref, g_ref, be_ref, w2_ref, b2_ref):
    # x_ref is already bf16: bf16 operands + f32 accumulation (full-rate MXU).
    h = jnp.dot(x_ref[...], w1_ref[...],
                preferred_element_type=jnp.float32)           # (TM, H) f32
    h = h + b1_ref[...]
    # exact (erf-based) gelu, matching transformers' `gelu`
    # TODO(synk): jax.nn.gelu(approximate=True) would move this to the EUP
    # slot on v5e but changes numerics vs the exact-erf reference.
    h = 0.5 * h * (1.0 + jax.lax.erf(h * _INV_SQRT2))
    # LayerNorm over the hidden axis (f32)
    mean = jnp.mean(h, axis=-1, keepdims=True)
    var = jnp.mean(jnp.square(h - mean), axis=-1, keepdims=True)
    h = (h - mean) * jax.lax.rsqrt(var + LAYER_NORM_EPS)
    h = h * g_ref[...] + be_ref[...]
    # decoder projection to vocab (+ tied bias)
    return (jnp.dot(h.astype(jnp.bfloat16), w2_ref[...],
                    preferred_element_type=jnp.float32) + b2_ref[...])


def _ce_partials(logits, labels):
    """Per-tile CE partials packed lane-dense: (8,128) f32 block with
    sum(nll) broadcast in sublane 0 and sum(valid) in sublane 1."""
    m = jnp.max(logits, axis=-1, keepdims=True)
    lse = m + jnp.log(jnp.sum(jnp.exp(logits - m), axis=-1, keepdims=True))
    col = jax.lax.broadcasted_iota(jnp.int32, logits.shape, 1)
    picked = jnp.sum(jnp.where(col == labels, logits, 0.0), axis=-1,
                     keepdims=True)                           # (TM, 1)
    valid = (labels != IGNORE_INDEX).astype(jnp.float32)      # (TM, 1)
    nll = jnp.sum((lse - picked) * valid)                     # scalar
    cnt = jnp.sum(valid)                                      # scalar
    sub = jax.lax.broadcasted_iota(jnp.int32, (8, 128), 0)
    return (jnp.where(sub == 0, nll, 0.0)
            + jnp.where(sub == 1, cnt, 0.0))                  # (8, 128)


# ---------------------------------------------------------------------------
# Kernel 1: prediction scores only (inference path), M axis parallel.
# ---------------------------------------------------------------------------
def _head_kernel(x_ref, w1_ref, b1_ref, g_ref, be_ref, w2_ref, b2_ref, out_ref):
    out_ref[...] = _tile_scores(x_ref, w1_ref, b1_ref, g_ref, be_ref,
                                w2_ref, b2_ref).astype(out_ref.dtype)


# ---------------------------------------------------------------------------
# Kernel 2: scores + per-tile CrossEntropy partials (parallel M axis).
# ---------------------------------------------------------------------------
def _head_ce_kernel(x_ref, labels_ref, w1_ref, b1_ref, g_ref, be_ref,
                    w2_ref, b2_ref, out_ref, part_ref):
    logits = _tile_scores(x_ref, w1_ref, b1_ref, g_ref, be_ref,
                          w2_ref, b2_ref)                     # (TM, V) f32
    out_ref[...] = logits.astype(out_ref.dtype)
    part_ref[0] = _ce_partials(logits, labels_ref[...])


# ---------------------------------------------------------------------------
# Kernel 3: loss-only path — logits never leave VMEM (no (M, V) HBM write).
# ---------------------------------------------------------------------------
def _head_loss_kernel(x_ref, labels_ref, w1_ref, b1_ref, g_ref, be_ref,
                      w2_ref, b2_ref, part_ref):
    logits = _tile_scores(x_ref, w1_ref, b1_ref, g_ref, be_ref,
                          w2_ref, b2_ref)                     # (TM, V) f32
    part_ref[0] = _ce_partials(logits, labels_ref[...])


# ---------------------------------------------------------------------------
# Wrappers
# ---------------------------------------------------------------------------
def _choose_tile_m(M, H, V):
    """Token-tile size: multiple of 16 (bf16 sublane packing), big enough to
    amortize per-step overhead, bounded so double-buffered blocks + f32 temps
    stay under the scoped VMEM budget, and preferring an exact divisor of M
    so the wrapper never pads x."""
    per_row_bytes = 8 * H + 12 * V            # rough live bytes per token row
    cap = max(16, (16 * 1024 * 1024) // per_row_bytes)
    target = max(16, (min(2048, cap, M) // 16) * 16)
    min_ok = max(16, min(target, 512))
    for cand in range(target, min_ok - 1, -16):
        if M % cand == 0:
            return cand
    return target


def _weight_specs(H, V):
    const = lambda i: (0, 0)                  # resident across the M grid
    return [
        pl.BlockSpec((H, H), const),          # w1 (bf16)
        pl.BlockSpec((1, H), const),          # b1
        pl.BlockSpec((1, H), const),          # gamma
        pl.BlockSpec((1, H), const),          # beta
        pl.BlockSpec((H, V), const),          # w2 (bf16)
        pl.BlockSpec((1, V), const),          # b2
    ]


def _prep_inputs(params, sequence_output):
    B, S, H = sequence_output.shape
    V = params["w2"].shape[1]
    M = B * S
    tm = _choose_tile_m(M, H, V)
    mp = -(-M // tm) * tm                     # pad M up to a tile multiple
    # bf16 x halves the dominant activation read; cast before the (rare) pad
    # so the pad pass also runs at half width.
    xb = sequence_output.reshape(M, H).astype(jnp.bfloat16)
    if mp != M:
        xb = jnp.pad(xb, ((0, mp - M), (0, 0)))
    weights = (
        params["w1"].astype(jnp.bfloat16),
        params["b1"].reshape(1, H).astype(jnp.float32),
        params["gamma"].reshape(1, H).astype(jnp.float32),
        params["beta"].reshape(1, H).astype(jnp.float32),
        params["w2"].astype(jnp.bfloat16),
        params["b2"].reshape(1, V).astype(jnp.float32),
    )
    return xb, weights, (B, S, H, V, M, mp, tm)


def _prep_labels(masked_lm_labels, M, mp):
    labels = masked_lm_labels.reshape(M).astype(jnp.int32)
    if mp != M:
        labels = jnp.pad(labels, (0, mp - M), constant_values=IGNORE_INDEX)
    return labels.reshape(mp, 1)


def _compiler_params():
    return pltpu.CompilerParams(dimension_semantics=("parallel",),
                                vmem_limit_bytes=_VMEM_LIMIT)


def decoder_head_scores(params, sequence_output, scores_dtype=jnp.bfloat16):
    xb, weights, (B, S, H, V, M, mp, tm) = _prep_inputs(params, sequence_output)
    out = pl.pallas_call(
        _head_kernel,
        out_shape=jax.ShapeDtypeStruct((mp, V), scores_dtype),
        grid=(mp // tm,),
        in_specs=[pl.BlockSpec((tm, H), lambda i: (i, 0))] + _weight_specs(H, V),
        out_specs=pl.BlockSpec((tm, V), lambda i: (i, 0)),
        compiler_params=_compiler_params(),
    )(xb, *weights)
    return out[:M].reshape(B, S, V)


def decoder_head_scores_and_loss(params, sequence_output, masked_lm_labels,
                                 scores_dtype=jnp.bfloat16):
    xb, weights, (B, S, H, V, M, mp, tm) = _prep_inputs(params, sequence_output)
    labels2d = _prep_labels(masked_lm_labels, M, mp)
    nt = mp // tm

    scores, part = pl.pallas_call(
        _head_ce_kernel,
        out_shape=(
            jax.ShapeDtypeStruct((mp, V), scores_dtype),      # prediction scores
            jax.ShapeDtypeStruct((nt, 8, 128), jnp.float32),  # per-tile partials
        ),
        grid=(nt,),
        in_specs=[pl.BlockSpec((tm, H), lambda i: (i, 0)),
                  pl.BlockSpec((tm, 1), lambda i: (i, 0))] + _weight_specs(H, V),
        out_specs=(
            pl.BlockSpec((tm, V), lambda i: (i, 0)),
            pl.BlockSpec((1, 8, 128), lambda i: (i, 0, 0)),
        ),
        compiler_params=_compiler_params(),
    )(xb, labels2d, *weights)

    # Tiny final reduction over per-tile partials (keeps the grid parallel).
    # TODO(synk): all-labels-ignored gives 0/0 = NaN, matching torch.
    loss = jnp.sum(part[:, 0, 0]) / jnp.sum(part[:, 1, 0])
    return loss, scores[:M].reshape(B, S, V)


def decoder_head_loss_only(params, sequence_output, masked_lm_labels):
    """Training variant for callers that only consume the loss: the (M, V)
    logits are never written to HBM."""
    xb, weights, (B, S, H, V, M, mp, tm) = _prep_inputs(params, sequence_output)
    labels2d = _prep_labels(masked_lm_labels, M, mp)
    nt = mp // tm

    part = pl.pallas_call(
        _head_loss_kernel,
        out_shape=jax.ShapeDtypeStruct((nt, 8, 128), jnp.float32),
        grid=(nt,),
        in_specs=[pl.BlockSpec((tm, H), lambda i: (i, 0)),
                  pl.BlockSpec((tm, 1), lambda i: (i, 0))] + _weight_specs(H, V),
        out_specs=pl.BlockSpec((1, 8, 128), lambda i: (i, 0, 0)),
        compiler_params=_compiler_params(),
    )(xb, labels2d, *weights)
    return jnp.sum(part[:, 0, 0]) / jnp.sum(part[:, 1, 0])


# ---------------------------------------------------------------------------
# Module wrapper (matches MyDecoderHead.forward semantics)
# ---------------------------------------------------------------------------
def init_params(key, hidden=HIDDEN, vocab=VOCAB, std=INITIALIZER_RANGE):
    k1, k2 = jax.random.split(key)
    return {
        # DecoderTransform.dense
        "w1": jax.random.normal(k1, (hidden, hidden), jnp.float32) * std,
        "b1": jnp.zeros((hidden,), jnp.float32),
        # DecoderTransform.LayerNorm
        "gamma": jnp.ones((hidden,), jnp.float32),
        "beta": jnp.zeros((hidden,), jnp.float32),
        # DecoderPredictionHead.decoder (no bias) + tied bias parameter
        "w2": jax.random.normal(k2, (hidden, vocab), jnp.float32) * std,
        "b2": jnp.zeros((vocab,), jnp.float32),
    }


def my_decoder_head(params, sequence_output, masked_lm_labels=None,
                    lm_labels=None, scores_dtype=jnp.bfloat16):
    # TODO(synk): lm_labels is unused in the original forward as well.
    if masked_lm_labels is None:
        return (decoder_head_scores(params, sequence_output,
                                    scores_dtype=scores_dtype),)
    loss, scores = decoder_head_scores_and_loss(params, sequence_output,
                                                masked_lm_labels,
                                                scores_dtype=scores_dtype)
    return (loss, scores)


# ---------------------------------------------------------------------------
# Pure-JAX f32 reference (for tolerance checks only)
# ---------------------------------------------------------------------------
def _ref_forward(params, sequence_output, masked_lm_labels):
    x = sequence_output.astype(jnp.float32)
    h = x @ params["w1"] + params["b1"]
    h = 0.5 * h * (1.0 + jax.lax.erf(h * _INV_SQRT2))
    mean = h.mean(-1, keepdims=True)
    var = ((h - mean) ** 2).mean(-1, keepdims=True)
    h = (h - mean) * jax.lax.rsqrt(var + LAYER_NORM_EPS)
    h = h * params["gamma"] + params["beta"]
    scores = h @ params["w2"] + params["b2"]
    V = scores.shape[-1]
    logits = scores.reshape(-1, V)
    labels = masked_lm_labels.reshape(-1)
    m = logits.max(-1, keepdims=True)
    lse = (m + jnp.log(jnp.exp(logits - m).sum(-1, keepdims=True)))[:, 0]
    picked = jnp.take_along_axis(logits, jnp.clip(labels, 0)[:, None], -1)[:, 0]
    valid = (labels != IGNORE_INDEX).astype(jnp.float32)
    loss = jnp.sum((lse - picked) * valid) / jnp.sum(valid)
    return loss, scores


if __name__ == "__main__":
    key = jax.random.PRNGKey(0)
    kp, kx, kl = jax.random.split(key, 3)

    B, S = 2, 8
    params = init_params(kp)
    sequence_output = jax.random.normal(kx, (B, S, HIDDEN), jnp.float32)
    labels = jax.random.randint(kl, (B, S), 0, VOCAB, dtype=jnp.int32)
    # mark a couple of positions as ignored (-100), as CrossEntropyLoss allows
    labels = labels.at[0, 0].set(IGNORE_INDEX).at[1, 3].set(IGNORE_INDEX)

    # inference path (scores only, parallel M axis, bf16 scores)
    (scores_only,) = my_decoder_head(params, sequence_output)
    # training path (fused scores + masked-LM CE loss, parallel partials)
    loss, scores = my_decoder_head(params, sequence_output, masked_lm_labels=labels)
    # loss-only path (no logits written to HBM)
    loss_only = decoder_head_loss_only(params, sequence_output, labels)
    jax.block_until_ready((scores_only, loss, scores, loss_only))

    assert scores_only.shape == (B, S, VOCAB)
    assert scores.shape == (B, S, VOCAB)
    assert loss.shape == ()
    assert bool(jnp.isfinite(loss))

    # tolerance check vs f32 reference (bf16 matmuls / bf16 score storage)
    ref_loss, ref_scores = _ref_forward(params, sequence_output, labels)
    assert float(jnp.max(jnp.abs(scores.astype(jnp.float32) - ref_scores))) < 5e-2
    assert abs(float(loss) - float(ref_loss)) < 5e-2
    assert abs(float(loss_only) - float(loss)) < 1e-4
    print("KERNEL_OK")
</pallas_src>

<mosaic_0001>
module attributes {stable_mosaic.version = 11 : i64} {
  func.func @_head_kernel(%arg0: i32, %arg1: memref<16x128xbf16, #tpu.memory_space<vmem>>, %arg2: memref<128x128xbf16, #tpu.memory_space<vmem>>, %arg3: memref<1x128xf32, #tpu.memory_space<vmem>>, %arg4: memref<1x128xf32, #tpu.memory_space<vmem>>, %arg5: memref<1x128xf32, #tpu.memory_space<vmem>>, %arg6: memref<128x256xbf16, #tpu.memory_space<vmem>>, %arg7: memref<1x256xf32, #tpu.memory_space<vmem>>, %arg8: memref<16x256xbf16, #tpu.memory_space<vmem>>) attributes {dimension_semantics = [#tpu.dimension_semantics<parallel>], iteration_bounds = array<i64: 1>, scalar_prefetch = 0 : i64, scratch_operands = 0 : i64, tpu.core_type = #tpu.core_type<tc>, window_params = [{transform_indices = @transform_0, window_bounds = array<i64: 16, 128>}, {pipeline_mode = #tpu.pipeline_mode<synchronous>, transform_indices = @transform_1, window_bounds = array<i64: 128, 128>}, {pipeline_mode = #tpu.pipeline_mode<synchronous>, transform_indices = @transform_2, window_bounds = array<i64: 1, 128>}, {pipeline_mode = #tpu.pipeline_mode<synchronous>, transform_indices = @transform_3, window_bounds = array<i64: 1, 128>}, {pipeline_mode = #tpu.pipeline_mode<synchronous>, transform_indices = @transform_4, window_bounds = array<i64: 1, 128>}, {pipeline_mode = #tpu.pipeline_mode<synchronous>, transform_indices = @transform_5, window_bounds = array<i64: 128, 256>}, {pipeline_mode = #tpu.pipeline_mode<synchronous>, transform_indices = @transform_6, window_bounds = array<i64: 1, 256>}, {transform_indices = @transform_7, window_bounds = array<i64: 16, 256>}]} {
    %c0 = arith.constant 0 : index
    %c0_0 = arith.constant 0 : index
    %0 = vector.load %arg1[%c0, %c0_0] : memref<16x128xbf16, #tpu.memory_space<vmem>>, vector<16x128xbf16>
    %c0_1 = arith.constant 0 : index
    %c0_2 = arith.constant 0 : index
    %1 = vector.load %arg2[%c0_1, %c0_2] : memref<128x128xbf16, #tpu.memory_space<vmem>>, vector<128x128xbf16>
    %cst = arith.constant dense<0.000000e+00> : vector<16x128xf32>
    %2 = tpu.matmul %0, %1, %cst {dimension_numbers = #tpu.dot_dimension_numbers<[1], [0], [0], [1], [0, 0, 1, 1], [], []>} : vector<16x128xbf16>, vector<128x128xbf16>, vector<16x128xf32> -> vector<16x128xf32>
    %c0_3 = arith.constant 0 : index
    %c0_4 = arith.constant 0 : index
    %3 = vector.load %arg3[%c0_3, %c0_4] : memref<1x128xf32, #tpu.memory_space<vmem>>, vector<1x128xf32>
    %4 = vector.broadcast %3 : vector<1x128xf32> to vector<16x128xf32>
    %5 = arith.addf %2, %4 : vector<16x128xf32>
    %cst_5 = arith.constant 5.000000e-01 : f32
    %6 = vector.broadcast %cst_5 : f32 to vector<16x128xf32>
    %7 = arith.mulf %6, %5 : vector<16x128xf32>
    %cst_6 = arith.constant 0.707106769 : f32
    %8 = vector.broadcast %cst_6 : f32 to vector<16x128xf32>
    %9 = arith.mulf %5, %8 : vector<16x128xf32>
    %10 = math.erf %9 : vector<16x128xf32>
    %cst_7 = arith.constant 1.000000e+00 : f32
    %11 = vector.broadcast %cst_7 : f32 to vector<16x128xf32>
    %12 = arith.addf %11, %10 : vector<16x128xf32>
    %13 = arith.mulf %7, %12 : vector<16x128xf32>
    %cst_8 = arith.constant dense<0.000000e+00> : vector<16xf32>
    %14 = vector.multi_reduction <add>, %13, %cst_8 [1] : vector<16x128xf32> to vector<16xf32>
    %15 = vector.shape_cast %14 : vector<16xf32> to vector<16x1xf32>
    %cst_9 = arith.constant 1.280000e+02 : f32
    %16 = vector.broadcast %cst_9 : f32 to vector<16x1xf32>
    %17 = arith.divf %15, %16 : vector<16x1xf32>
    %18 = vector.broadcast %17 : vector<16x1xf32> to vector<16x128xf32>
    %19 = arith.subf %13, %18 : vector<16x128xf32>
    %20 = arith.mulf %19, %19 : vector<16x128xf32>
    %cst_10 = arith.constant dense<0.000000e+00> : vector<16xf32>
    %21 = vector.multi_reduction <add>, %20, %cst_10 [1] : vector<16x128xf32> to vector<16xf32>
    %22 = vector.shape_cast %21 : vector<16xf32> to vector<16x1xf32>
    %cst_11 = arith.constant 1.280000e+02 : f32
    %23 = vector.broadcast %cst_11 : f32 to vector<16x1xf32>
    %24 = arith.divf %22, %23 : vector<16x1xf32>
    %25 = vector.broadcast %17 : vector<16x1xf32> to vector<16x128xf32>
    %26 = arith.subf %13, %25 : vector<16x128xf32>
    %cst_12 = arith.constant 9.99999996E-13 : f32
    %27 = vector.broadcast %cst_12 : f32 to vector<16x1xf32>
    %28 = arith.addf %24, %27 : vector<16x1xf32>
    %29 = math.rsqrt %28 : vector<16x1xf32>
    %30 = vector.broadcast %29 : vector<16x1xf32> to vector<16x128xf32>
    %31 = arith.mulf %26, %30 : vector<16x128xf32>
    %c0_13 = arith.constant 0 : index
    %c0_14 = arith.constant 0 : index
    %32 = vector.load %arg4[%c0_13, %c0_14] : memref<1x128xf32, #tpu.memory_space<vmem>>, vector<1x128xf32>
    %33 = vector.broadcast %32 : vector<1x128xf32> to vector<16x128xf32>
    %34 = arith.mulf %31, %33 : vector<16x128xf32>
    %c0_15 = arith.constant 0 : index
    %c0_16 = arith.constant 0 : index
    %35 = vector.load %arg5[%c0_15, %c0_16] : memref<1x128xf32, #tpu.memory_space<vmem>>, vector<1x128xf32>
    %36 = vector.broadcast %35 : vector<1x128xf32> to vector<16x128xf32>
    %37 = arith.addf %34, %36 : vector<16x128xf32>
    %38 = arith.truncf %37 : vector<16x128xf32> to vector<16x128xbf16>
    %c0_17 = arith.constant 0 : index
    %c0_18 = arith.constant 0 : index
    %39 = vector.load %arg6[%c0_17, %c0_18] : memref<128x256xbf16, #tpu.memory_space<vmem>>, vector<128x256xbf16>
    %cst_19 = arith.constant dense<0.000000e+00> : vector<16x256xf32>
    %40 = tpu.matmul %38, %39, %cst_19 {dimension_numbers = #tpu.dot_dimension_numbers<[1], [0], [0], [1], [0, 0, 1, 1], [], []>} : vector<16x128xbf16>, vector<128x256xbf16>, vector<16x256xf32> -> vector<16x256xf32>
    %c0_20 = arith.constant 0 : index
    %c0_21 = arith.constant 0 : index
    %41 = vector.load %arg7[%c0_20, %c0_21] : memref<1x256xf32, #tpu.memory_space<vmem>>, vector<1x256xf32>
    %42 = vector.broadcast %41 : vector<1x256xf32> to vector<16x256xf32>
    %43 = arith.addf %40, %42 : vector<16x256xf32>
    %44 = arith.truncf %43 : vector<16x256xf32> to vector<16x256xbf16>
    %c0_22 = arith.constant 0 : index
    %c0_23 = arith.constant 0 : index
    %45 = vector.load %arg8[%c0_22, %c0_23] : memref<16x256xbf16, #tpu.memory_space<vmem>>, vector<16x256xbf16>
    tpu.vector_store %arg8[%c0_22, %c0_23], %44 {strides = array<i32>} : memref<16x256xbf16, #tpu.memory_space<vmem>>, vector<16x256xbf16>,
    return
  }
  func.func @transform_0(%arg0: i32) -> (i32, i32) {
    %c0_i32 = arith.constant 0 : i32
    %c0_i32_0 = arith.constant 0 : i32
    return %arg0, %c0_i32 : i32, i32
  }
  func.func @transform_1(%arg0: i32) -> (i32, i32) {
    %c0_i32 = arith.constant 0 : i32
    %c0_i32_0 = arith.constant 0 : i32
    %c0_i32_1 = arith.constant 0 : i32
    return %c0_i32, %c0_i32_0 : i32, i32
  }
  func.func @transform_2(%arg0: i32) -> (i32, i32) {
    %c0_i32 = arith.constant 0 : i32
    %c0_i32_0 = arith.constant 0 : i32
    %c0_i32_1 = arith.constant 0 : i32
    return %c0_i32, %c0_i32_0 : i32, i32
  }
  func.func @transform_3(%arg0: i32) -> (i32, i32) {
    %c0_i32 = arith.constant 0 : i32
    %c0_i32_0 = arith.constant 0 : i32
    %c0_i32_1 = arith.constant 0 : i32
    return %c0_i32, %c0_i32_0 : i32, i32
  }
  func.func @transform_4(%arg0: i32) -> (i32, i32) {
    %c0_i32 = arith.constant 0 : i32
    %c0_i32_0 = arith.constant 0 : i32
    %c0_i32_1 = arith.constant 0 : i32
    return %c0_i32, %c0_i32_0 : i32, i32
  }
  func.func @transform_5(%arg0: i32) -> (i32, i32) {
    %c0_i32 = arith.constant 0 : i32
    %c0_i32_0 = arith.constant 0 : i32
    %c0_i32_1 = arith.constant 0 : i32
    return %c0_i32, %c0_i32_0 : i32, i32
  }
  func.func @transform_6(%arg0: i32) -> (i32, i32) {
    %c0_i32 = arith.constant 0 : i32
    %c0_i32_0 = arith.constant 0 : i32
    %c0_i32_1 = arith.constant 0 : i32
    return %c0_i32, %c0_i32_0 : i32, i32
  }
  func.func @transform_7(%arg0: i32) -> (i32, i32) {
    %c0_i32 = arith.constant 0 : i32
    %c0_i32_0 = arith.constant 0 : i32
    return %arg0, %c0_i32 : i32, i32
  }
}

</mosaic_0001>

<bundles_post_ra>
// kernel: tpu_custom_call.1
= control target key start
LH: loop header
LB: loop body
LE: loop exit
PB: predicated region body
PF: predicated region fallthrough
CT: control target
= control target key end

     0   :  { %12 = vsyncpa [#allocation3], 0  ;;  %s755_s0 = inlined_call_operand.hbm [shape: bf16[16,128], index: 0, kind: input, shape index: {}]   ;;  %s756_s1 = inlined_call_operand.hbm [shape: bf16[128,128], index: 1, kind: input, shape index: {}]   ;;  %s757_s2 = inlined_call_operand.vmem [shape: f32[1,128], index: 2, kind: input, shape index: {}]   ;;  %s758_s3 = inlined_call_operand.vmem [shape: f32[1,128], index: 3, kind: input, shape index: {}]   ;;  %s759_s4 = inlined_call_operand.vmem [shape: f32[1,128], index: 4, kind: input, shape index: {}]   ;;  %s760_s5 = inlined_call_operand.hbm [shape: bf16[128,256], index: 5, kind: input, shape index: {}]   ;;  %s761_s6 = inlined_call_operand.vmem [shape: f32[1,256], index: 6, kind: input, shape index: {}]   ;;  %s762_s7 = inlined_call_operand.hbm [shape: bf16[16,256], index: 7, kind: output, shape index: {}]  }
   0x1   :  { %13 = vsyncpa [#allocation6], 0 }
   0x2   :  { %14 = vsyncpa [#allocation4], 0  ;;  %s631_s24 = smov [#allocation5]   ;;  %s632_s26 = smov [#allocation2]  }
   0x3   :  { %s32_s25 = sshll.u32 %s631_s24, 4  ;;  %s20_s27 = sshll.u32 %s632_s26, 4  ;;  %s33_s25 = int_to_ptr.vmem [resolvable:$true] %s32_s25  ;;  %s682_s27 = int_to_ptr.vmem [resolvable:$true] %s20_s27 }
   0x4   :  { %s537_s30 = scalar_lea.hbm %s756_s1, 1024 }
   0x5   :  { %p538_p0 = scmp.ne.s32.totalorder %s756_s1, %s537_s30  ;;  %p541_p1 = scmp.lt.u32.totalorder %s537_s30, %s756_s1 }
   0x7   :  { %p543_p2 = pnand %p541_p1, %p538_p0 }
   0x9   :  { %546 = shalt.err (!%p543_p2)
}
   0xa   :  { %s547_s12 = scalar_lea.vmem %s33_s25, 1024  ;;  %p552_p4 = scmp.lt.s32.totalorder %s33_s25, %s33_s25 }
   0xb   :  { %p548_p3 = scmp.ne.s32.totalorder %s33_s25, %s547_s12  ;;  %p553_p5 = scmp.lt.s32.totalorder %s547_s12, %s547_s12 }
   0xd   :  { %p554_p6 = por %p553_p5, %p552_p4 }
   0xf   :  { %p555_p7 = pnand %p554_p6, %p548_p3 }
  0x11   :  { %558 = shalt.err (!%p555_p7)
}
  0x12   :  { %s633_s13 = smov 64   ;;  %s634_s14 = smov 4  }
  0x13   :  { %38 = dma.hbm_to_vmem [thread:$0]  %s756_s1, 1024, %s33_s25, [#allocation6], %s633_s13, %s633_s13, %s634_s14  }
  0x14   :  { %s559_s19 = scalar_lea.hbm %s755_s0, 128 }
  0x15   :  { %p560_p8 = scmp.ne.s32.totalorder %s755_s0, %s559_s19  ;;  %p563_p9 = scmp.lt.u32.totalorder %s559_s19, %s755_s0 }
  0x17   :  { %p565_p10 = pnand %p563_p9, %p560_p8 }
  0x19   :  { %568 = shalt.err (!%p565_p10)
}
  0x1a   :  { %s569_s24 = scalar_lea.vmem %s682_s27, 128  ;;  %p574_p12 = scmp.lt.s32.totalorder %s682_s27, %s682_s27 }
  0x1b   :  { %p570_p11 = scmp.ne.s32.totalorder %s682_s27, %s569_s24  ;;  %p575_p13 = scmp.lt.s32.totalorder %s569_s24, %s569_s24 }
  0x1d   :  { %p576_p0 = por %p575_p13, %p574_p12 }
  0x1f   :  { %p577_p1 = pnand %p576_p0, %p570_p11 }
  0x21   :  { %580 = shalt.err (!%p577_p1)
}
  0x22   :  { %26 = dma.hbm_to_vmem [thread:$0]  %s755_s0, 128, %s682_s27, [#allocation3], %s633_s13, %s633_s13, %s634_s14  }
  0x23   :  { %s635_s26 = smov [#allocation7]   ;;  %s581_s8 = scalar_lea.hbm %s760_s5, 2048 }
  0x24   :  { %s50_s28 = sshll.u32 %s635_s26, 4  ;;  %p582_p2 = scmp.ne.s32.totalorder %s760_s5, %s581_s8  ;;  %s51_s28 = int_to_ptr.vmem [resolvable:$true] %s50_s28 }
  0x25   :  { %p585_p3 = scmp.lt.u32.totalorder %s581_s8, %s760_s5 }
  0x27   :  { %p587_p4 = pnand %p585_p3, %p582_p2 }
  0x29   :  { %590 = shalt.err (!%p587_p4)
}
  0x2a   :  { %s591_s15 = scalar_lea.vmem %s51_s28, 2048  ;;  %p596_p6 = scmp.lt.s32.totalorder %s51_s28, %s51_s28 }
  0x2b   :  { %p592_p5 = scmp.ne.s32.totalorder %s51_s28, %s591_s15  ;;  %p597_p7 = scmp.lt.s32.totalorder %s591_s15, %s591_s15 }
  0x2d   :  { %p598_p8 = por %p597_p7, %p596_p6 }
  0x2f   :  { %p599_p9 = pnand %p598_p8, %p592_p5 }
  0x31   :  { %602 = shalt.err (!%p599_p9)
}
  0x32   :  { %s636_s0 = smov 128   ;;  %s637_s27 = smov 8  }
  0x33   :  { %56 = dma.hbm_to_vmem [thread:$0]  %s760_s5, 2048, %s51_s28, [#allocation6], %s636_s0, %s636_s0, %s637_s27  }
  0x34   :  { %625 = dma.done.wait [#allocation3], 128  }
  0x35   :  { %626 = vsyncadd [#allocation3], 4294967168 }
  0x36   :  { %627 = dma.done.wait [#allocation6], 3072  }
  0x37   :  { %628 = vsyncadd [#allocation6], 4294964224  ;;  %v638_v0 = vmov 0.0   ;;  %vm639_vm0 = vmmov 0   ;;  %v496_v1 = vld [vmem:[#allocation5] sm:$0xff]   ;;  %v497_v2 = vld [vmem:[#allocation5 + $0x8] sm:$0xff]  }
  0x38   :  { %465 = vmatprep.subr.bf16.mxu0 %v638_v0  ;;  %481 = vmatprep.mubr.msk.bf16.mxu0 %vm639_vm0, %v638_v0  ;;  %v498_v3 = vld [vmem:[#allocation5 + $0x10] sm:$0xff]   ;;  %v499_v4 = vld [vmem:[#allocation5 + $0x18] sm:$0xff]   ;;  %v500_v5 = vld [vmem:[#allocation5 + $0x20] sm:$0xff]   ;;  %v640_v46 = vmov 0  }
  0x39   :  { %466 = vmatpush3.bf16.msra.mxu0 %v496_v1  ;;  %v501_v6 = vld [vmem:[#allocation5 + $0x28] sm:$0xff]   ;;  %v502_v7 = vld [vmem:[#allocation5 + $0x30] sm:$0xff]   ;;  %v503_v8 = vld [vmem:[#allocation5 + $0x38] sm:$0xff]   ;;  %381 = vmatprep.mubr.bf16.mxu1 %v640_v46 }
  0x3a   :  { %467 = vmatprep.subr.bf16.mxu0 %v638_v0  ;;  %v504_v9 = vld [vmem:[#allocation2] sm:$0xff]   ;;  %v505_v27 = vld [vmem:[#allocation7 + $0x4] ss:$8 sps:$4 sm:$0xff]   ;;  %v507_v28 = vld [vmem:[#allocation7] ss:$8 sps:$4 sm:$0xff]  }
  0x3b   :  { %v424_v10 = vld [vmem:[%s757_s2] ss:$0 sm:$0xff]  ;;  %v508_v29 = vld [vmem:[#allocation7 + $0x14] ss:$8 sps:$4 sm:$0xff]   ;;  %349 = vmatprep.subr.bf16.mxu1 %v505_v27  ;;  %v511_v39 = vld [vmem:[#allocation7 + $0x24] ss:$8 sps:$4 sm:$0xff]  }
  0x3c   :  { %350 = vmatpush1.bf16.msra.mxu1 %v507_v28  ;;  %v510_v38 = vld [vmem:[#allocation7 + $0x10] ss:$8 sps:$4 sm:$0xff]   ;;  %v513_v40 = vld [vmem:[#allocation7 + $0x20] ss:$8 sps:$4 sm:$0xff]   ;;  %v514_v41 = vld [vmem:[#allocation7 + $0x34] ss:$8 sps:$4 sm:$0xff]  }
  0x3d   :  { %468 = vmatpush3.bf16.msra.mxu0 %v497_v2  ;;  %351 = vmatprep.subr.bf16.mxu1 %v508_v29  ;;  %v516_v42 = vld [vmem:[#allocation7 + $0x30] ss:$8 sps:$4 sm:$0xff]   ;;  %v517_v43 = vld [vmem:[#allocation7 + $0x44] ss:$8 sps:$4 sm:$0xff]   ;;  %v519_v44 = vld [vmem:[#allocation7 + $0x40] ss:$8 sps:$4 sm:$0xff]  }
  0x3e   :  { %469 = vmatprep.subr.bf16.mxu0 %v638_v0  ;;  %v520_v45 = vld [vmem:[#allocation7 + $0x54] ss:$8 sps:$4 sm:$0xff]   ;;  %v522_v47 = vld [vmem:[#allocation7 + $0x50] ss:$8 sps:$4 sm:$0xff]   ;;  %v523_v48 = vld [vmem:[#allocation7 + $0x64] ss:$8 sps:$4 sm:$0xff]  }
  0x3f   :  { %v525_v49 = vld [vmem:[#allocation7 + $0x60] ss:$8 sps:$4 sm:$0xff]   ;;  %v526_v50 = vld [vmem:[#allocation7 + $0x74] ss:$8 sps:$4 sm:$0xff]   ;;  %v528_v51 = vld [vmem:[#allocation7 + $0x70] ss:$8 sps:$4 sm:$0xff]  }
  0x40   :  { %352 = vmatpush1.bf16.msra.mxu1 %v510_v38  ;;  %v434_v60 = vld [vmem:[%s758_s3] ss:$0 sm:$0xff]  ;;  %s641_s3 = smov [#allocation8]  }
  0x41   :  { %470 = vmatpush3.bf16.msra.mxu0 %v498_v3  ;;  %353 = vmatprep.subr.bf16.mxu1 %v511_v39 }
  0x42   :  { %471 = vmatprep.subr.bf16.mxu0 %v638_v0 }
  0x44   :  { %354 = vmatpush1.bf16.msra.mxu1 %v513_v40 }
  0x45   :  { %472 = vmatpush3.bf16.msra.mxu0 %v499_v4  ;;  %355 = vmatprep.subr.bf16.mxu1 %v514_v41 }
  0x46   :  { %473 = vmatprep.subr.bf16.mxu0 %v638_v0 }
  0x48   :  { %356 = vmatpush1.bf16.msra.mxu1 %v516_v42 }
  0x49   :  { %474 = vmatpush3.bf16.msra.mxu0 %v500_v5  ;;  %357 = vmatprep.subr.bf16.mxu1 %v517_v43  ;;  %v259_v5 = vlaneseq }
  0x4a   :  { %475 = vmatprep.subr.bf16.mxu0 %v638_v0 }
  0x4c   :  { %358 = vmatpush1.bf16.msra.mxu1 %v519_v44 }
  0x4d   :  { %476 = vmatpush3.bf16.msra.mxu0 %v501_v6  ;;  %359 = vmatprep.subr.bf16.mxu1 %v520_v45  ;;  %v260_v6 = vshrl.u32 %v259_v5, 7 }
  0x4e   :  { %477 = vmatprep.subr.bf16.mxu0 %v638_v0 }
  0x50   :  { %360 = vmatpush1.bf16.msra.mxu1 %v522_v47 }
  0x51   :  { %478 = vmatpush3.bf16.msra.mxu0 %v502_v7  ;;  %361 = vmatprep.subr.bf16.mxu1 %v523_v48  ;;  %v261_v7 = vsub.s32 0, %v260_v6 }
  0x52   :  { %479 = vmatprep.subr.bf16.mxu0 %v638_v0  ;;  %v435_v0 = vld [vmem:[%s759_s4] ss:$0 sm:$0xff]  ;;  %s411_s4 = sshll.u32 %s641_s3, 4  ;;  %s412_s4 = int_to_ptr.vmem [resolvable:$true] %s411_s4 }
  0x53   :  { %s603_s22 = scalar_lea.vmem %s412_s4, 256  ;;  %p608_p11 = scmp.lt.s32.totalorder %s412_s4, %s412_s4 }
  0x54   :  { %362 = vmatpush1.bf16.msra.mxu1 %v525_v49  ;;  %p604_p10 = scmp.ne.s32.totalorder %s412_s4, %s603_s22  ;;  %p609_p12 = scmp.lt.s32.totalorder %s603_s22, %s603_s22 }
  0x55   :  { %480 = vmatpush3.bf16.msra.mxu0 %v503_v8  ;;  %363 = vmatprep.subr.bf16.mxu1 %v526_v50  ;;  %v257_v8 = vld [vmem:[%s761_s6] sm:$0x3] }
  0x56   :  { %p610_p13 = por %p609_p12, %p608_p11 }
  0x58   :  { %482 = vmatmul.mubr.bf16.vlgmr.msra.gmra.mrb[0].mxu0 %v504_v9  ;;  %364 = vmatpush1.bf16.msra.mxu1 %v528_v51  ;;  %v265_v9 = vsub.s32 1, %v260_v6  ;;  %p611_p0 = pnand %p610_p13, %p604_p10 }
 0x12b   :  { %v182_v11 = vpop.f32.mrb[0].mxu0 }
 0x12c   :  { %v183_v12 = vadd.f32 %v424_v10, %v182_v11  ;;  %v483_v13 = vpop.f32.mrb[1].mxu0  ;;  %v266_v11 = vrot.slane %v257_v8, %v265_v9 }
 0x12d   :  { %v185_v14 = vpop.f32.mrb[2].mxu0 }
 0x12e   :  { %v191_v15 = vmul.f32 0.70710677, %v183_v12  ;;  %v186_v16 = vadd.f32 %v424_v10, %v185_v14  ;;  %v484_v17 = vpop.f32.mrb[3].mxu0  ;;  %v189_v20 = vmul.f32 0.5, %v183_v12  ;;  %v262_v10 = vrot.slane %v257_v8, %v261_v7 }
 0x130   :  { %529 = verf.f32 %v191_v15  ;;  %v192_v18 = vmul.f32 0.70710677, %v186_v16  ;;  %v190_v25 = vmul.f32 0.5, %v186_v16 }
 0x132   :  { %531 = verf.f32 %v192_v18 }
 0x13a   :  { %v530_v19 = vpop.eup %529 }
 0x13b   :  { %v195_v21 = vadd.f32 1.0, %v530_v19 }
 0x13c   :  { %v532_v22 = vpop.eup %531 }
 0x13d   :  { %v197_v23 = vmul.f32 %v195_v21, %v189_v20  ;;  %v196_v24 = vadd.f32 1.0, %v532_v22 }
 0x13f   :  { %199 = vadd.xlane.f32.xlu0 %v197_v23  ;;  %v198_v26 = vmul.f32 %v196_v24, %v190_v25 }
 0x143   :  { %201 = vadd.xlane.f32.xlu0 %v198_v26 }
 0x1cc   :  { %v200_v30 = vpop.xlane.xlu0 %199 }
 0x1cd   :  { %v204_v31 = vmul.f32 0.0078125, %v200_v30 }
 0x1cf   :  { %v206_v32 = vsub.f32 %v197_v23, %v204_v31 }
 0x1d0   :  { %v202_v33 = vpop.xlane.xlu0 %201 }
 0x1d1   :  { %v205_v34 = vmul.f32 0.0078125, %v202_v33  ;;  %v208_v35 = vmul.f32 %v206_v32, %v206_v32 }
 0x1d3   :  { %v207_v36 = vsub.f32 %v198_v26, %v205_v34  ;;  %210 = vadd.xlane.f32.xlu1 %v208_v35 }
 0x1d5   :  { %v209_v37 = vmul.f32 %v207_v36, %v207_v36 }
 0x1d7   :  { %212 = vadd.xlane.f32.xlu1 %v209_v37 }
 0x260   :  { %v211_v52 = vpop.xlane.xlu1 %210 }
 0x261   :  { %v214_v53 = vmul.f32 0.0078125, %v211_v52 }
 0x263   :  { %v216_v54 = vadd.f32 1e-12, %v214_v53 }
 0x264   :  { %v213_v55 = vpop.xlane.xlu1 %212 }
 0x265   :  { %533 = vrsqrt.f32 %v216_v54  ;;  %v215_v56 = vmul.f32 0.0078125, %v213_v55 }
 0x267   :  { %v217_v57 = vadd.f32 1e-12, %v215_v56 }
 0x269   :  { %535 = vrsqrt.f32 %v217_v57 }
 0x26f   :  { %v534_v58 = vpop.eup %533 }
 0x270   :  { %v220_v59 = vmul.f32 %v534_v58, %v206_v32 }
 0x272   :  { %v229_v63 = vmul.f32 %v434_v60, %v220_v59 }
 0x273   :  { %v536_v61 = vpop.eup %535 }
 0x274   :  { %v221_v62 = vmul.f32 %v536_v61, %v207_v36  ;;  %v238_v2 = vadd.f32 %v435_v0, %v229_v63 }
 0x276   :  { %v230_v1 = vmul.f32 %v434_v60, %v221_v62 }
 0x278   :  { %v239_v3 = vadd.f32 %v435_v0, %v230_v1 }
 0x27a   :  { %v240_v4 = vpack.c.bf16 %v239_v3, %v238_v2 }
 0x27c   :  { %382 = vmatmul.mubr.bf16.vlgmr.msra.gmra.mrb[0].mxu1 %v240_v4 }
 0x34f   :  { %v383_v12 = vpop.f32.mrb[0].mxu1 }
 0x350   :  { %v384_v13 = vadd.f32 %v383_v12, %v262_v10  ;;  %v385_v14 = vpop.f32.mrb[1].mxu1 }
 0x351   :  { %v386_v15 = vadd.f32 %v385_v14, %v266_v11  ;;  %v387_v16 = vpop.f32.mrb[2].mxu1 }
 0x352   :  { %v388_v17 = vadd.f32 %v387_v16, %v262_v10  ;;  %v389_v18 = vpop.f32.mrb[3].mxu1 }
 0x353   :  { %v454_v19 = vpack.c.bf16 %v386_v15, %v384_v13  ;;  %v390_v20 = vadd.f32 %v389_v18, %v266_v11 }
 0x355   :  { %404 = vst [vmem:[#allocation8] sm:$0xff] %v454_v19  ;;  %v455_v21 = vpack.c.bf16 %v390_v20, %v388_v17 }
 0x357   :  { %405 = vst [vmem:[#allocation8 + $0x8] sm:$0xff] %v455_v21 }
 0x358   :  { %614 = shalt.err (!%p611_p0)
}
 0x359   :  { %s615_s24 = scalar_lea.hbm %s762_s7, 256 }
 0x35a   :  { %p616_p1 = scmp.ne.s32.totalorder %s762_s7, %s615_s24  ;;  %p619_p2 = scmp.lt.u32.totalorder %s615_s24, %s762_s7 }
 0x35c   :  { %p621_p3 = pnand %p619_p2, %p616_p1 }
 0x35e   :  { %624 = shalt.err (!%p621_p3)
}
 0x35f   :  { %417 = dma.vmem_to_hbm [thread:$0]  %s412_s4, 256, %s762_s7, [#allocation4], %s636_s0, %s636_s0, %s637_s27  }
 0x360   :  { %629 = dma.done.wait [#allocation4], 256  }
 0x361   :  { %630 = vsyncadd [#allocation4], 4294967040 }
 0x362   :  { %421 = vsyncpa [#allocation3], 1 }
 0x363   :  { %422 = vsyncpa [#allocation6], 1 }
 0x364   :  { %423 = vsyncpa [#allocation4], 1 }

</bundles_post_ra>
